<compile_context>
chip_gen: v7x
topology: tpu7x:2x2x1
jax: 0.10.0
libtpu: 0.0.40
codegen_flags: <defaults>
</compile_context>

<pallas_src>
import functools

import numpy as np
import jax
import jax.numpy as jnp
from jax import lax
from jax.experimental import pallas as pl
from jax.experimental.pallas import tpu as pltpu


def _fpblock_kernel(x_ref, w_up_ref, b_up_ref, wl_ref, wr_ref,
                    w_lo_ref, b_lo_ref, o_ref, *, W, k, eps, inv_hw):
    B_blk, Cpad, HWp = x_ref.shape
    F = w_up_ref.shape[0]
    p = k // 2

    # Small weights hoisted out of the per-sample loop (amortized over B_blk).
    w_up = w_up_ref[...]                                   # (F, Cpad)
    b_up = b_up_ref[...]                                   # (F, 1)
    w_lo = w_lo_ref[...]                                   # (Cout, F)
    b_lo = b_lo_ref[...]                                   # (Cout, 1)

    def sample_body(b, carry):
        x = x_ref[b]                                       # (Cpad, HWp)

        # ---- upper: 1x1 conv (BN scale pre-folded) + bias + ReLU ----
        y = jnp.dot(w_up, x, preferred_element_type=jnp.float32)   # (F, HWp)
        y = jnp.maximum(y + b_up, 0.0)

        # ---- fused left/right depthwise kxk conv ----
        # One lane-roll per tap (shared by both branches); the tap tables are
        # (mask * per-channel weight), so each branch is a single FMA per tap
        # against an aligned (F, HWp) tile — no mask slice / broadcast.
        acc_l = jnp.zeros((F, HWp), jnp.float32)
        acc_r = jnp.zeros((F, HWp), jnp.float32)
        for dy in range(k):
            for dx in range(k):
                t = dy * k + dx
                off = (dy - p) * W + (dx - p)
                sh = y if off == 0 else pltpu.roll(y, (-off) % HWp, axis=1)
                acc_l = acc_l + sh * wl_ref[t]
                acc_r = acc_r + sh * wr_ref[t]

        # ---- InstanceNorm2d (biased var, no affine) + ReLU, merged stats ----
        # Both branches stacked on sublanes -> one pair of lane reductions and
        # one rsqrt.  Padded lanes hold exact zeros so sums are unaffected;
        # variance clamped (one-pass E[x^2]-m^2 can cancel slightly negative).
        ab = jnp.concatenate([acc_l, acc_r], axis=0)       # (2F, HWp)
        s1 = jnp.sum(ab, axis=1, keepdims=True)
        s2 = jnp.sum(ab * ab, axis=1, keepdims=True)
        mu = s1 * inv_hw
        var = jnp.maximum(s2 * inv_hw - mu * mu, 0.0)
        nb = jnp.maximum((ab - mu) * lax.rsqrt(var + eps), 0.0)
        prod = nb[0:F, :] * nb[F:2 * F, :]                 # (F, HWp)

        # ---- lower: 1x1 conv (BN scale pre-folded) + bias + ReLU ----
        z = jnp.dot(w_lo, prod, preferred_element_type=jnp.float32)  # (Cout, HWp)
        z = jnp.maximum(z + b_lo, 0.0)

        # ---- residual add: x already channel-padded to Cout -> single
        # full-width, lane-dense (unmasked) store ----
        o_ref[b] = z + x
        return carry

    lax.fori_loop(0, B_blk, sample_body, 0)


def fpblock_forward_nchw(x_nchw, params, *, k, eps=1e-5):
    """x_nchw: (N, Cin, H, W) float32 -> (N, Cout, H, W) float32."""
    w_up, s_up, b_up, w_l, w_r, w_lo, s_lo, b_lo = params
    N, Cin, H, W = x_nchw.shape
    F = w_up.shape[0]
    Cout = w_lo.shape[0]
    HW = H * W
    assert Cout >= Cin, "residual channel padding assumes out_dim >= in_dim"
    assert k % 2 == 1, "odd kernel size assumed (padding = k//2)"
    # Conservative guard for the roll+mask halo trick on small images.
    assert k // 2 < H and k // 2 < W, "k//2 must be < H and < W"

    HWp = ((HW + 127) // 128) * 128      # lane-dense spatial axis
    Cpad = Cout                          # input channel-padded to Cout

    # Fold BatchNorm (eval) scales into the 1x1 conv weights; pad the upper
    # weight with zero columns so it consumes the channel-padded input.
    w_up_f = jnp.pad((w_up * s_up[:, None]).astype(jnp.float32),
                     ((0, 0), (0, Cpad - Cin)))            # (F, Cpad)
    w_lo_f = (w_lo * s_lo[:, None]).astype(jnp.float32)    # (Cout, F)
    b_up_c = b_up.reshape(F, 1).astype(jnp.float32)
    b_lo_c = b_lo.reshape(Cout, 1).astype(jnp.float32)

    # Per-tap (halo mask * per-channel depthwise weight) tables: (k*k, F, HWp).
    # Masks are zero on out-of-image taps and on the spatial padding.
    p = k // 2
    rows = np.arange(HW) // W
    cols = np.arange(HW) % W
    masks_np = np.zeros((k * k, HWp), np.float32)
    for dy in range(k):
        for dx in range(k):
            valid = ((rows + dy - p >= 0) & (rows + dy - p < H)
                     & (cols + dx - p >= 0) & (cols + dx - p < W))
            masks_np[dy * k + dx, :HW] = valid.astype(np.float32)
    masks = jnp.asarray(masks_np)                                   # (k*k, HWp)
    wl2 = w_l.reshape(F, k * k).astype(jnp.float32)
    wr2 = w_r.reshape(F, k * k).astype(jnp.float32)
    wl_tab = masks[:, None, :] * wl2.T[:, :, None]                  # (k*k, F, HWp)
    wr_tab = masks[:, None, :] * wr2.T[:, :, None]                  # (k*k, F, HWp)

    # ---- batch folding / block sizing ----
    # Keep >= 2 grid steps when N >= 2 (v7x dual TensorCore) and keep blocks
    # comfortably under the v7x 32 MiB scoped-VMEM default (double-buffered
    # x/out blocks + the constant tap tables).
    B_blk = max(1, min(8, N // 2)) if N >= 2 else 1
    per_sample_bytes = (Cpad + Cout) * HWp * 4
    table_bytes = 2 * (k * k) * F * HWp * 4
    budget = 24 * 1024 * 1024
    max_b = max(1, int((budget - 2 * table_bytes) // max(1, 2 * per_sample_bytes)))
    B_blk = max(1, min(B_blk, max_b))
    G = -(-N // B_blk)
    Npad = G * B_blk

    # NCHW -> (N, C, H*W) is a free reshape; pad batch / channels / lanes.
    x = x_nchw.reshape(N, Cin, HW)
    x_p = jnp.pad(x, ((0, Npad - N), (0, Cpad - Cin), (0, HWp - HW)))

    kernel = functools.partial(_fpblock_kernel, W=W, k=k, eps=eps,
                               inv_hw=1.0 / float(HW))

    out = pl.pallas_call(
        kernel,
        out_shape=jax.ShapeDtypeStruct((Npad, Cout, HWp), jnp.float32),
        grid=(G,),
        in_specs=[
            pl.BlockSpec((B_blk, Cpad, HWp), lambda g: (g, 0, 0)),   # x batch slab
            pl.BlockSpec((F, Cpad), lambda g: (0, 0)),               # w_up (folded)
            pl.BlockSpec((F, 1), lambda g: (0, 0)),                  # bn_up bias
            pl.BlockSpec((k * k, F, HWp), lambda g: (0, 0, 0)),      # left tap table
            pl.BlockSpec((k * k, F, HWp), lambda g: (0, 0, 0)),      # right tap table
            pl.BlockSpec((Cout, F), lambda g: (0, 0)),               # w_lower (folded)
            pl.BlockSpec((Cout, 1), lambda g: (0, 0)),               # bn_lo bias
        ],
        out_specs=pl.BlockSpec((B_blk, Cout, HWp), lambda g: (g, 0, 0)),
        compiler_params=pltpu.CompilerParams(
            dimension_semantics=("parallel",)),
    )(x_p, w_up_f, b_up_c, wl_tab, wr_tab, w_lo_f, b_lo_c)

    return out[:N, :, :HW].reshape(N, Cout, H, W)


def reference_nchw(x, params, *, k, eps=1e-5):
    """Pure-JAX reference (lax convs, NCHW) for correctness check."""
    w_up, s_up, b_up, w_l, w_r, w_lo, s_lo, b_lo = params
    N, Cin, H, W = x.shape
    F = w_up.shape[0]
    Cout = w_lo.shape[0]
    dn = ('NCHW', 'OIHW', 'NCHW')

    y = lax.conv_general_dilated(x, w_up.reshape(F, Cin, 1, 1), (1, 1), 'SAME',
                                 dimension_numbers=dn)
    y = jnp.maximum(y * s_up[None, :, None, None]
                    + b_up[None, :, None, None], 0.0)

    def dw(w):
        a = lax.conv_general_dilated(y, w.reshape(F, 1, k, k), (1, 1), 'SAME',
                                     dimension_numbers=dn,
                                     feature_group_count=F)
        mu = jnp.mean(a, axis=(2, 3), keepdims=True)
        var = jnp.mean((a - mu) ** 2, axis=(2, 3), keepdims=True)  # biased var
        return jnp.maximum((a - mu) * lax.rsqrt(var + eps), 0.0)

    prod = dw(w_l) * dw(w_r)
    z = lax.conv_general_dilated(prod, w_lo.reshape(Cout, F, 1, 1), (1, 1),
                                 'SAME', dimension_numbers=dn)
    z = jnp.maximum(z * s_lo[None, :, None, None]
                    + b_lo[None, :, None, None], 0.0)
    sc = jnp.pad(x, ((0, 0), (0, Cout - Cin), (0, 0), (0, 0)))
    return z + sc


if __name__ == "__main__":
    # FPBlockJOV(in_dim=4, out_dim=8, k=3, stride=1, q=2.0, use_1x1=False)
    N, Cin, H, W = 2, 4, 16, 16
    out_dim, k, q = 8, 3, 2.0
    F = int(q * out_dim)      # feat_dim = 16
    Cout = out_dim
    eps = 1e-5

    key = jax.random.PRNGKey(0)
    ks = jax.random.split(key, 16)

    x = jax.random.normal(ks[0], (N, Cin, H, W), jnp.float32)

    # Conv weights (PyTorch 1x1 conv weight (Cout,Cin,1,1) -> (Cout,Cin) here;
    # depthwise weight (F,1,k,k) -> (F,k,k) here).
    w_up = jax.random.normal(ks[1], (F, Cin), jnp.float32) * 0.3
    w_l = jax.random.normal(ks[2], (F, k, k), jnp.float32) * 0.3
    w_r = jax.random.normal(ks[3], (F, k, k), jnp.float32) * 0.3
    w_lo = jax.random.normal(ks[4], (Cout, F), jnp.float32) * 0.3

    def bn_fold(kg, kb, km, kv, C):
        gamma = jax.random.uniform(kg, (C,), jnp.float32, 0.5, 1.5)
        beta = jax.random.normal(kb, (C,), jnp.float32) * 0.1
        mean = jax.random.normal(km, (C,), jnp.float32) * 0.1
        var = jax.random.uniform(kv, (C,), jnp.float32, 0.5, 1.5)
        s = gamma * lax.rsqrt(var + eps)
        b = beta - mean * s
        return s, b

    s_up, b_up = bn_fold(ks[5], ks[6], ks[7], ks[8], F)
    s_lo, b_lo = bn_fold(ks[9], ks[10], ks[11], ks[12], Cout)

    params = (w_up, s_up, b_up, w_l, w_r, w_lo, s_lo, b_lo)

    out = jax.block_until_ready(fpblock_forward_nchw(x, params, k=k, eps=eps))
    ref = jax.block_until_ready(reference_nchw(x, params, k=k, eps=eps))

    assert out.shape == (N, Cout, H, W), out.shape
    err = float(jnp.max(jnp.abs(out - ref)))
    assert err < 2e-2, f"max abs err {err}"
    print("KERNEL_OK")
</pallas_src>

<mosaic_0001>
module attributes {stable_mosaic.version = 11 : i64} {
  func.func @_fpblock_kernel(%arg0: i32, %arg1: memref<1x8x256xf32, #tpu.memory_space<vmem>>, %arg2: memref<16x8xf32, #tpu.memory_space<vmem>>, %arg3: memref<16x1xf32, #tpu.memory_space<vmem>>, %arg4: memref<9x16x256xf32, #tpu.memory_space<vmem>>, %arg5: memref<9x16x256xf32, #tpu.memory_space<vmem>>, %arg6: memref<8x16xf32, #tpu.memory_space<vmem>>, %arg7: memref<8x1xf32, #tpu.memory_space<vmem>>, %arg8: memref<1x8x256xf32, #tpu.memory_space<vmem>>) attributes {dimension_semantics = [#tpu.dimension_semantics<parallel>], iteration_bounds = array<i64: 2>, scalar_prefetch = 0 : i64, scratch_operands = 0 : i64, tpu.core_type = #tpu.core_type<tc>, window_params = [{transform_indices = @transform_0, window_bounds = array<i64: 1, 8, 256>}, {pipeline_mode = #tpu.pipeline_mode<synchronous>, transform_indices = @transform_1, window_bounds = array<i64: 16, 8>}, {pipeline_mode = #tpu.pipeline_mode<synchronous>, transform_indices = @transform_2, window_bounds = array<i64: 16, 1>}, {pipeline_mode = #tpu.pipeline_mode<synchronous>, transform_indices = @transform_3, window_bounds = array<i64: 9, 16, 256>}, {pipeline_mode = #tpu.pipeline_mode<synchronous>, transform_indices = @transform_4, window_bounds = array<i64: 9, 16, 256>}, {pipeline_mode = #tpu.pipeline_mode<synchronous>, transform_indices = @transform_5, window_bounds = array<i64: 8, 16>}, {pipeline_mode = #tpu.pipeline_mode<synchronous>, transform_indices = @transform_6, window_bounds = array<i64: 8, 1>}, {transform_indices = @transform_7, window_bounds = array<i64: 1, 8, 256>}]} {
    %c0 = arith.constant 0 : index
    %c0_0 = arith.constant 0 : index
    %0 = vector.load %arg2[%c0, %c0_0] : memref<16x8xf32, #tpu.memory_space<vmem>>, vector<16x8xf32>
    %c0_1 = arith.constant 0 : index
    %c0_2 = arith.constant 0 : index
    %1 = vector.load %arg3[%c0_1, %c0_2] : memref<16x1xf32, #tpu.memory_space<vmem>>, vector<16x1xf32>
    %c0_3 = arith.constant 0 : index
    %c0_4 = arith.constant 0 : index
    %2 = vector.load %arg6[%c0_3, %c0_4] : memref<8x16xf32, #tpu.memory_space<vmem>>, vector<8x16xf32>
    %c0_5 = arith.constant 0 : index
    %c0_6 = arith.constant 0 : index
    %3 = vector.load %arg7[%c0_5, %c0_6] : memref<8x1xf32, #tpu.memory_space<vmem>>, vector<8x1xf32>
    %c0_i32 = arith.constant 0 : i32
    %4 = arith.index_cast %c0_i32 : i32 to index
    %c0_7 = arith.constant 0 : index
    %c0_8 = arith.constant 0 : index
    %5 = vector.load %arg1[%4, %c0_7, %c0_8] : memref<1x8x256xf32, #tpu.memory_space<vmem>>, vector<1x8x256xf32>
    %6 = vector.shape_cast %5 : vector<1x8x256xf32> to vector<8x256xf32>
    %cst = arith.constant dense<0.000000e+00> : vector<16x256xf32>
    %7 = tpu.matmul %0, %6, %cst {dimension_numbers = #tpu.dot_dimension_numbers<[1], [0], [0], [1], [0, 0, 1, 1], [], []>} : vector<16x8xf32>, vector<8x256xf32>, vector<16x256xf32> -> vector<16x256xf32>
    %8 = vector.broadcast %1 : vector<16x1xf32> to vector<16x256xf32>
    %9 = arith.addf %7, %8 : vector<16x256xf32>
    %cst_9 = arith.constant 0.000000e+00 : f32
    %10 = vector.broadcast %cst_9 : f32 to vector<16x256xf32>
    %11 = arith.maximumf %9, %10 : vector<16x256xf32>
    %cst_10 = arith.constant 0.000000e+00 : f32
    %12 = vector.broadcast %cst_10 : f32 to vector<16x256xf32>
    %cst_11 = arith.constant 0.000000e+00 : f32
    %13 = vector.broadcast %cst_11 : f32 to vector<16x256xf32>
    %c17_i32 = arith.constant 17 : i32
    %14 = tpu.dynamic_rotate %11 by %c17_i32 dim 1 : vector<16x256xf32>, i32 -> vector<16x256xf32>
    %c0_12 = arith.constant 0 : index
    %c0_13 = arith.constant 0 : index
    %c0_14 = arith.constant 0 : index
    %15 = vector.load %arg4[%c0_12, %c0_13, %c0_14] : memref<9x16x256xf32, #tpu.memory_space<vmem>>, vector<1x16x256xf32>
    %16 = vector.shape_cast %15 : vector<1x16x256xf32> to vector<16x256xf32>
    %17 = arith.mulf %14, %16 : vector<16x256xf32>
    %18 = arith.addf %12, %17 : vector<16x256xf32>
    %c0_15 = arith.constant 0 : index
    %c0_16 = arith.constant 0 : index
    %c0_17 = arith.constant 0 : index
    %19 = vector.load %arg5[%c0_15, %c0_16, %c0_17] : memref<9x16x256xf32, #tpu.memory_space<vmem>>, vector<1x16x256xf32>
    %20 = vector.shape_cast %19 : vector<1x16x256xf32> to vector<16x256xf32>
    %21 = arith.mulf %14, %20 : vector<16x256xf32>
    %22 = arith.addf %13, %21 : vector<16x256xf32>
    %c16_i32 = arith.constant 16 : i32
    %23 = tpu.dynamic_rotate %11 by %c16_i32 dim 1 : vector<16x256xf32>, i32 -> vector<16x256xf32>
    %c1 = arith.constant 1 : index
    %c0_18 = arith.constant 0 : index
    %c0_19 = arith.constant 0 : index
    %24 = vector.load %arg4[%c1, %c0_18, %c0_19] : memref<9x16x256xf32, #tpu.memory_space<vmem>>, vector<1x16x256xf32>
    %25 = vector.shape_cast %24 : vector<1x16x256xf32> to vector<16x256xf32>
    %26 = arith.mulf %23, %25 : vector<16x256xf32>
    %27 = arith.addf %18, %26 : vector<16x256xf32>
    %c1_20 = arith.constant 1 : index
    %c0_21 = arith.constant 0 : index
    %c0_22 = arith.constant 0 : index
    %28 = vector.load %arg5[%c1_20, %c0_21, %c0_22] : memref<9x16x256xf32, #tpu.memory_space<vmem>>, vector<1x16x256xf32>
    %29 = vector.shape_cast %28 : vector<1x16x256xf32> to vector<16x256xf32>
    %30 = arith.mulf %23, %29 : vector<16x256xf32>
    %31 = arith.addf %22, %30 : vector<16x256xf32>
    %c15_i32 = arith.constant 15 : i32
    %32 = tpu.dynamic_rotate %11 by %c15_i32 dim 1 : vector<16x256xf32>, i32 -> vector<16x256xf32>
    %c2 = arith.constant 2 : index
    %c0_23 = arith.constant 0 : index
    %c0_24 = arith.constant 0 : index
    %33 = vector.load %arg4[%c2, %c0_23, %c0_24] : memref<9x16x256xf32, #tpu.memory_space<vmem>>, vector<1x16x256xf32>
    %34 = vector.shape_cast %33 : vector<1x16x256xf32> to vector<16x256xf32>
    %35 = arith.mulf %32, %34 : vector<16x256xf32>
    %36 = arith.addf %27, %35 : vector<16x256xf32>
    %c2_25 = arith.constant 2 : index
    %c0_26 = arith.constant 0 : index
    %c0_27 = arith.constant 0 : index
    %37 = vector.load %arg5[%c2_25, %c0_26, %c0_27] : memref<9x16x256xf32, #tpu.memory_space<vmem>>, vector<1x16x256xf32>
    %38 = vector.shape_cast %37 : vector<1x16x256xf32> to vector<16x256xf32>
    %39 = arith.mulf %32, %38 : vector<16x256xf32>
    %40 = arith.addf %31, %39 : vector<16x256xf32>
    %c1_i32 = arith.constant 1 : i32
    %41 = tpu.dynamic_rotate %11 by %c1_i32 dim 1 : vector<16x256xf32>, i32 -> vector<16x256xf32>
    %c3 = arith.constant 3 : index
    %c0_28 = arith.constant 0 : index
    %c0_29 = arith.constant 0 : index
    %42 = vector.load %arg4[%c3, %c0_28, %c0_29] : memref<9x16x256xf32, #tpu.memory_space<vmem>>, vector<1x16x256xf32>
    %43 = vector.shape_cast %42 : vector<1x16x256xf32> to vector<16x256xf32>
    %44 = arith.mulf %41, %43 : vector<16x256xf32>
    %45 = arith.addf %36, %44 : vector<16x256xf32>
    %c3_30 = arith.constant 3 : index
    %c0_31 = arith.constant 0 : index
    %c0_32 = arith.constant 0 : index
    %46 = vector.load %arg5[%c3_30, %c0_31, %c0_32] : memref<9x16x256xf32, #tpu.memory_space<vmem>>, vector<1x16x256xf32>
    %47 = vector.shape_cast %46 : vector<1x16x256xf32> to vector<16x256xf32>
    %48 = arith.mulf %41, %47 : vector<16x256xf32>
    %49 = arith.addf %40, %48 : vector<16x256xf32>
    %c4 = arith.constant 4 : index
    %c0_33 = arith.constant 0 : index
    %c0_34 = arith.constant 0 : index
    %50 = vector.load %arg4[%c4, %c0_33, %c0_34] : memref<9x16x256xf32, #tpu.memory_space<vmem>>, vector<1x16x256xf32>
    %51 = vector.shape_cast %50 : vector<1x16x256xf32> to vector<16x256xf32>
    %52 = arith.mulf %11, %51 : vector<16x256xf32>
    %53 = arith.addf %45, %52 : vector<16x256xf32>
    %c4_35 = arith.constant 4 : index
    %c0_36 = arith.constant 0 : index
    %c0_37 = arith.constant 0 : index
    %54 = vector.load %arg5[%c4_35, %c0_36, %c0_37] : memref<9x16x256xf32, #tpu.memory_space<vmem>>, vector<1x16x256xf32>
    %55 = vector.shape_cast %54 : vector<1x16x256xf32> to vector<16x256xf32>
    %56 = arith.mulf %11, %55 : vector<16x256xf32>
    %57 = arith.addf %49, %56 : vector<16x256xf32>
    %c255_i32 = arith.constant 255 : i32
    %58 = tpu.dynamic_rotate %11 by %c255_i32 dim 1 : vector<16x256xf32>, i32 -> vector<16x256xf32>
    %c5 = arith.constant 5 : index
    %c0_38 = arith.constant 0 : index
    %c0_39 = arith.constant 0 : index
    %59 = vector.load %arg4[%c5, %c0_38, %c0_39] : memref<9x16x256xf32, #tpu.memory_space<vmem>>, vector<1x16x256xf32>
    %60 = vector.shape_cast %59 : vector<1x16x256xf32> to vector<16x256xf32>
    %61 = arith.mulf %58, %60 : vector<16x256xf32>
    %62 = arith.addf %53, %61 : vector<16x256xf32>
    %c5_40 = arith.constant 5 : index
    %c0_41 = arith.constant 0 : index
    %c0_42 = arith.constant 0 : index
    %63 = vector.load %arg5[%c5_40, %c0_41, %c0_42] : memref<9x16x256xf32, #tpu.memory_space<vmem>>, vector<1x16x256xf32>
    %64 = vector.shape_cast %63 : vector<1x16x256xf32> to vector<16x256xf32>
    %65 = arith.mulf %58, %64 : vector<16x256xf32>
    %66 = arith.addf %57, %65 : vector<16x256xf32>
    %c241_i32 = arith.constant 241 : i32
    %67 = tpu.dynamic_rotate %11 by %c241_i32 dim 1 : vector<16x256xf32>, i32 -> vector<16x256xf32>
    %c6 = arith.constant 6 : index
    %c0_43 = arith.constant 0 : index
    %c0_44 = arith.constant 0 : index
    %68 = vector.load %arg4[%c6, %c0_43, %c0_44] : memref<9x16x256xf32, #tpu.memory_space<vmem>>, vector<1x16x256xf32>
    %69 = vector.shape_cast %68 : vector<1x16x256xf32> to vector<16x256xf32>
    %70 = arith.mulf %67, %69 : vector<16x256xf32>
    %71 = arith.addf %62, %70 : vector<16x256xf32>
    %c6_45 = arith.constant 6 : index
    %c0_46 = arith.constant 0 : index
    %c0_47 = arith.constant 0 : index
    %72 = vector.load %arg5[%c6_45, %c0_46, %c0_47] : memref<9x16x256xf32, #tpu.memory_space<vmem>>, vector<1x16x256xf32>
    %73 = vector.shape_cast %72 : vector<1x16x256xf32> to vector<16x256xf32>
    %74 = arith.mulf %67, %73 : vector<16x256xf32>
    %75 = arith.addf %66, %74 : vector<16x256xf32>
    %c240_i32 = arith.constant 240 : i32
    %76 = tpu.dynamic_rotate %11 by %c240_i32 dim 1 : vector<16x256xf32>, i32 -> vector<16x256xf32>
    %c7 = arith.constant 7 : index
    %c0_48 = arith.constant 0 : index
    %c0_49 = arith.constant 0 : index
    %77 = vector.load %arg4[%c7, %c0_48, %c0_49] : memref<9x16x256xf32, #tpu.memory_space<vmem>>, vector<1x16x256xf32>
    %78 = vector.shape_cast %77 : vector<1x16x256xf32> to vector<16x256xf32>
    %79 = arith.mulf %76, %78 : vector<16x256xf32>
    %80 = arith.addf %71, %79 : vector<16x256xf32>
    %c7_50 = arith.constant 7 : index
    %c0_51 = arith.constant 0 : index
    %c0_52 = arith.constant 0 : index
    %81 = vector.load %arg5[%c7_50, %c0_51, %c0_52] : memref<9x16x256xf32, #tpu.memory_space<vmem>>, vector<1x16x256xf32>
    %82 = vector.shape_cast %81 : vector<1x16x256xf32> to vector<16x256xf32>
    %83 = arith.mulf %76, %82 : vector<16x256xf32>
    %84 = arith.addf %75, %83 : vector<16x256xf32>
    %c239_i32 = arith.constant 239 : i32
    %85 = tpu.dynamic_rotate %11 by %c239_i32 dim 1 : vector<16x256xf32>, i32 -> vector<16x256xf32>
    %c8 = arith.constant 8 : index
    %c0_53 = arith.constant 0 : index
    %c0_54 = arith.constant 0 : index
    %86 = vector.load %arg4[%c8, %c0_53, %c0_54] : memref<9x16x256xf32, #tpu.memory_space<vmem>>, vector<1x16x256xf32>
    %87 = vector.shape_cast %86 : vector<1x16x256xf32> to vector<16x256xf32>
    %88 = arith.mulf %85, %87 : vector<16x256xf32>
    %89 = arith.addf %80, %88 : vector<16x256xf32>
    %c8_55 = arith.constant 8 : index
    %c0_56 = arith.constant 0 : index
    %c0_57 = arith.constant 0 : index
    %90 = vector.load %arg5[%c8_55, %c0_56, %c0_57] : memref<9x16x256xf32, #tpu.memory_space<vmem>>, vector<1x16x256xf32>
    %91 = vector.shape_cast %90 : vector<1x16x256xf32> to vector<16x256xf32>
    %92 = arith.mulf %85, %91 : vector<16x256xf32>
    %93 = arith.addf %84, %92 : vector<16x256xf32>
    %94 = tpu.concatenate %89, %93 in 0 : vector<16x256xf32>, vector<16x256xf32> -> vector<32x256xf32>
    %cst_58 = arith.constant dense<0.000000e+00> : vector<32xf32>
    %95 = vector.multi_reduction <add>, %94, %cst_58 [1] : vector<32x256xf32> to vector<32xf32>
    %96 = vector.shape_cast %95 : vector<32xf32> to vector<32x1xf32>
    %97 = arith.mulf %94, %94 : vector<32x256xf32>
    %cst_59 = arith.constant dense<0.000000e+00> : vector<32xf32>
    %98 = vector.multi_reduction <add>, %97, %cst_59 [1] : vector<32x256xf32> to vector<32xf32>
    %99 = vector.shape_cast %98 : vector<32xf32> to vector<32x1xf32>
    %cst_60 = arith.constant 3.906250e-03 : f32
    %100 = vector.broadcast %cst_60 : f32 to vector<32x1xf32>
    %101 = arith.mulf %96, %100 : vector<32x1xf32>
    %cst_61 = arith.constant 3.906250e-03 : f32
    %102 = vector.broadcast %cst_61 : f32 to vector<32x1xf32>
    %103 = arith.mulf %99, %102 : vector<32x1xf32>
    %104 = arith.mulf %101, %101 : vector<32x1xf32>
    %105 = arith.subf %103, %104 : vector<32x1xf32>
    %cst_62 = arith.constant 0.000000e+00 : f32
    %106 = vector.broadcast %cst_62 : f32 to vector<32x1xf32>
    %107 = arith.maximumf %105, %106 : vector<32x1xf32>
    %108 = vector.broadcast %101 : vector<32x1xf32> to vector<32x256xf32>
    %109 = arith.subf %94, %108 : vector<32x256xf32>
    %cst_63 = arith.constant 9.99999974E-6 : f32
    %110 = vector.broadcast %cst_63 : f32 to vector<32x1xf32>
    %111 = arith.addf %107, %110 : vector<32x1xf32>
    %112 = math.rsqrt %111 : vector<32x1xf32>
    %113 = vector.broadcast %112 : vector<32x1xf32> to vector<32x256xf32>
    %114 = arith.mulf %109, %113 : vector<32x256xf32>
    %cst_64 = arith.constant 0.000000e+00 : f32
    %115 = vector.broadcast %cst_64 : f32 to vector<32x256xf32>
    %116 = arith.maximumf %114, %115 : vector<32x256xf32>
    %117 = vector.extract_strided_slice %116 {offsets = [0, 0], sizes = [16, 256], strides = [1, 1]} : vector<32x256xf32> to vector<16x256xf32>
    %118 = vector.extract_strided_slice %116 {offsets = [16, 0], sizes = [16, 256], strides = [1, 1]} : vector<32x256xf32> to vector<16x256xf32>
    %119 = arith.mulf %117, %118 : vector<16x256xf32>
    %cst_65 = arith.constant dense<0.000000e+00> : vector<8x256xf32>
    %120 = tpu.matmul %2, %119, %cst_65 {dimension_numbers = #tpu.dot_dimension_numbers<[1], [0], [0], [1], [0, 0, 1, 1], [], []>} : vector<8x16xf32>, vector<16x256xf32>, vector<8x256xf32> -> vector<8x256xf32>
    %121 = vector.broadcast %3 : vector<8x1xf32> to vector<8x256xf32>
    %122 = arith.addf %120, %121 : vector<8x256xf32>
    %cst_66 = arith.constant 0.000000e+00 : f32
    %123 = vector.broadcast %cst_66 : f32 to vector<8x256xf32>
    %124 = arith.maximumf %122, %123 : vector<8x256xf32>
    %125 = arith.addf %124, %6 : vector<8x256xf32>
    %126 = arith.index_cast %c0_i32 : i32 to index
    %c0_67 = arith.constant 0 : index
    %c0_68 = arith.constant 0 : index
    %127 = vector.load %arg8[%126, %c0_67, %c0_68] : memref<1x8x256xf32, #tpu.memory_space<vmem>>, vector<1x8x256xf32>
    %128 = vector.shape_cast %127 : vector<1x8x256xf32> to vector<8x256xf32>
    %129 = vector.shape_cast %125 : vector<8x256xf32> to vector<1x8x256xf32>
    tpu.vector_store %arg8[%126, %c0_67, %c0_68], %129 {strides = array<i32>} : memref<1x8x256xf32, #tpu.memory_space<vmem>>, vector<1x8x256xf32>,
    %c1_i32_69 = arith.constant 1 : i32
    return
  }
  func.func @transform_0(%arg0: i32) -> (i32, i32, i32) {
    %c0_i32 = arith.constant 0 : i32
    %c0_i32_0 = arith.constant 0 : i32
    %c0_i32_1 = arith.constant 0 : i32
    return %arg0, %c0_i32, %c0_i32_0 : i32, i32, i32
  }
  func.func @transform_1(%arg0: i32) -> (i32, i32) {
    %c0_i32 = arith.constant 0 : i32
    %c0_i32_0 = arith.constant 0 : i32
    %c0_i32_1 = arith.constant 0 : i32
    return %c0_i32, %c0_i32_0 : i32, i32
  }
  func.func @transform_2(%arg0: i32) -> (i32, i32) {
    %c0_i32 = arith.constant 0 : i32
    %c0_i32_0 = arith.constant 0 : i32
    %c0_i32_1 = arith.constant 0 : i32
    return %c0_i32, %c0_i32_0 : i32, i32
  }
  func.func @transform_3(%arg0: i32) -> (i32, i32, i32) {
    %c0_i32 = arith.constant 0 : i32
    %c0_i32_0 = arith.constant 0 : i32
    %c0_i32_1 = arith.constant 0 : i32
    %c0_i32_2 = arith.constant 0 : i32
    return %c0_i32, %c0_i32_0, %c0_i32_1 : i32, i32, i32
  }
  func.func @transform_4(%arg0: i32) -> (i32, i32, i32) {
    %c0_i32 = arith.constant 0 : i32
    %c0_i32_0 = arith.constant 0 : i32
    %c0_i32_1 = arith.constant 0 : i32
    %c0_i32_2 = arith.constant 0 : i32
    return %c0_i32, %c0_i32_0, %c0_i32_1 : i32, i32, i32
  }
  func.func @transform_5(%arg0: i32) -> (i32, i32) {
    %c0_i32 = arith.constant 0 : i32
    %c0_i32_0 = arith.constant 0 : i32
    %c0_i32_1 = arith.constant 0 : i32
    return %c0_i32, %c0_i32_0 : i32, i32
  }
  func.func @transform_6(%arg0: i32) -> (i32, i32) {
    %c0_i32 = arith.constant 0 : i32
    %c0_i32_0 = arith.constant 0 : i32
    %c0_i32_1 = arith.constant 0 : i32
    return %c0_i32, %c0_i32_0 : i32, i32
  }
  func.func @transform_7(%arg0: i32) -> (i32, i32, i32) {
    %c0_i32 = arith.constant 0 : i32
    %c0_i32_0 = arith.constant 0 : i32
    %c0_i32_1 = arith.constant 0 : i32
    return %arg0, %c0_i32, %c0_i32_0 : i32, i32, i32
  }
}

</mosaic_0001>

<bundles_post_ra>
// kernel: tpu_custom_call.1
= control target key start
LH: loop header
LB: loop body
LE: loop exit
PB: predicated region body
PF: predicated region fallthrough
CT: control target
= control target key end

     0   :  { %12 = vsyncpa [#allocation3], 0  ;;  %s1763_s0 = inlined_call_operand.vmem [shape: f32[2,8,256], index: 0, kind: input, shape index: {}]   ;;  %s1764_s1 = inlined_call_operand.vmem [shape: f32[16,8], index: 1, kind: input, shape index: {}]   ;;  %s1765_s2 = inlined_call_operand.vmem [shape: f32[16,1], index: 2, kind: input, shape index: {}]   ;;  %s1766_s3 = inlined_call_operand.hbm [shape: f32[9,16,256], index: 3, kind: input, shape index: {}]   ;;  %s1767_s4 = inlined_call_operand.hbm [shape: f32[9,16,256], index: 4, kind: input, shape index: {}]   ;;  %s1768_s5 = inlined_call_operand.vmem [shape: f32[8,16], index: 5, kind: input, shape index: {}]   ;;  %s1769_s6 = inlined_call_operand.vmem [shape: f32[8,1], index: 6, kind: input, shape index: {}]   ;;  %s1770_s7 = inlined_call_operand.hbm [shape: f32[2,8,256], index: 7, kind: output, shape index: {}]  }
   0x1   :  { %13 = vsyncpa [#allocation6], 0 }
   0x2   :  { %14 = vsyncpa [#allocation4], 0 }
   0x3   :  { %16 = vsyncpa [#allocation4 + $0x1], 0  ;;  %s1311_s24 = smov 0   ;;  %s1313_s25 = smov 0  }
   0x4   :  { %s1315_s26 = smov 0   ;;  %s1317_s27 = smov 0  }
   0x5 LB: > { %s1332_s28 = sadd.s32 4294967295, %s1254_s27   ;;  %s1021_s29 = sadd.s32 4294967294, %s1254_s27   ;;  %s1254_s27 = sphi %s1317_s27, %s1790_s27   ;;  %s1250_s26 = sphi %s1315_s26, %s1789_s26   ;;  %s1246_s25 = sphi %s1313_s25, %s1788_s25   ;;  %s1242_s24 = sphi %s1311_s24, %s1787_s24  }
   0x6   : > { %s1336_s30 = sadd.s32 1, %s1254_s27   ;;  %s181_s8 = sadd.s32 1, %s1250_s26 }
   0x7   : > { %s178_s9 = ssub.s32 %s1254_s27, %s1336_s30  ;;  %p191_p0 = scmp.ne.s32.totalorder %s1250_s26, %s1246_s25 }
   0x8   : > { %p179_p1 = scmp.eq.s32.totalorder %s178_s9, 0  ;;  %p192_p2 = scmp.eq.s32.totalorder %s1332_s28, 1 }
   0x9   : > { %p197_p3 = scmp.ne.s32.totalorder %s1246_s25, %s1242_s24  ;;  %p198_p4 = scmp.eq.s32.totalorder %s1021_s29, 1 }
   0xa   : > { %s1347_s10 = scalar_select %p179_p1, %s1250_s26, %s181_s8  }
   0xb   : > { %p1349_p5 = por %p192_p2, %p191_p0  ;;  %p1353_p6 = por %p198_p4, %p197_p3 }
   0xc   : > { %1774 = sst [smem:[#allocation11_spill]] %s1347_s10  ;;  %p1022_p7 = scmp.ge.s32.totalorder %s1254_s27, 1 }
   0xd   : > { %s1775_s11 = scalar_select %p1349_p5, 1, 0 }
   0xe   : > { %s1776_s12 = scalar_select %p1353_p6, 1, 0 }
   0xf   : > { %p205_p8 = scmp.lt.s32.totalorder %s1254_s27, 3  ;;  %p1771_p9 = scmp.eq.s32.totalorder %s1332_s28, 0 }
  0x10   : > { %s1256_s14 = smov [#allocation2]   ;;  %s1257_s17 = smov [#allocation5]  }
  0x11   : > { %p1360_p10 = pnand %p1022_p7, %p205_p8  ;;  %s223_s15 = sshll.u32 %s1256_s14, 4  ;;  %s224_s15 = int_to_ptr.vmem [resolvable:$true] %s223_s15 }
  0x12   : > { %s236_s18 = sshll.u32 %s1257_s17, 4  ;;  %s1128_s21 = scalar_lea.hbm %s1766_s3, 4608  ;;  %s1372_s18 = int_to_ptr.vmem [resolvable:$true] %s236_s18 }
  0x13   : > { %s1777_s13 = scalar_select %p1360_p10, 1, 0 }
  0x14   : > { %p1056_p11 = pneg %p1360_p10  ;;  %p1129_p13 = scmp.ne.s32.totalorder %s1766_s3, %s1128_s21 }
  0x15   : > { %p1135_p3 = scmp.lt.u32.totalorder %s1128_s21, %s1766_s3 }
  0x16   : > { %p1368_p12 = pnand %p1771_p9, %p1056_p11 }
  0x18   : > { %p1130_p0 = pneg %p1368_p12 }
  0x1a   : > { %p1131_p1 = pnand %p1130_p0, %p1129_p13 }
  0x1c   : > { %p1132_p2 = pneg %p1131_p1 }
  0x1e   : > { %p1137_p4 = pnand %p1135_p3, %p1132_p2 }
  0x20   : > { %1140 = shalt.err (!%p1137_p4)
}
  0x21   : > { %s1141_s9 = scalar_lea.vmem %s224_s15, 4608  ;;  %p1149_p9 = scmp.lt.s32.totalorder %s224_s15, %s224_s15 }
  0x22   : > { %p1142_p7 = scmp.ne.s32.totalorder %s224_s15, %s1141_s9  ;;  %p1150_p6 = scmp.lt.s32.totalorder %s1141_s9, %s1141_s9 }
  0x24   : > { %p1144_p8 = pnand %p1142_p7, %p1130_p0  ;;  %p1151_p5 = por %p1150_p6, %p1149_p9 }
  0x26   : > { %p1145_p11 = pneg %p1144_p8 }
  0x28   : > { %p1152_p10 = pnand %p1151_p5, %p1145_p11 }
  0x2a   : > { %1155 = shalt.err (!%p1152_p10)
}
  0x2b   : > { %s1258_s14 = smov 256   ;;  %s1259_s17 = smov 16  }
  0x2c   : > { %1059 = dma.hbm_to_vmem [thread:$0]  (!%p1368_p12), %s1766_s3, 4608, %s224_s15, [#allocation3], %s1258_s14, %s1258_s14, %s1259_s17  }
  0x2d   : > { %s1156_s23 = scalar_lea.hbm %s1767_s4, 4608 }
  0x2e   : > { %p1157_p13 = scmp.ne.s32.totalorder %s1767_s4, %s1156_s23  ;;  %p1163_p9 = scmp.lt.u32.totalorder %s1156_s23, %s1767_s4 }
  0x30   : > { %p1159_p5 = pnand %p1157_p13, %p1130_p0 }
  0x32   : > { %p1160_p6 = pneg %p1159_p5 }
  0x34   : > { %p1165_p10 = pnand %p1163_p9, %p1160_p6 }
  0x36   : > { %1168 = shalt.err (!%p1165_p10)
}
  0x37   : > { %s1169_s15 = scalar_lea.vmem %s1372_s18, 4608  ;;  %p1177_p4 = scmp.lt.s32.totalorder %s1372_s18, %s1372_s18 }
  0x38   : > { %p1170_p1 = scmp.ne.s32.totalorder %s1372_s18, %s1169_s15  ;;  %p1178_p7 = scmp.lt.s32.totalorder %s1169_s15, %s1169_s15 }
  0x3a   : > { %p1172_p2 = pnand %p1170_p1, %p1130_p0  ;;  %p1179_p8 = por %p1178_p7, %p1177_p4 }
  0x3c   : > { %p1173_p3 = pneg %p1172_p2 }
  0x3e   : > { %p1180_p11 = pnand %p1179_p8, %p1173_p3 }
  0x40   : > { %1183 = shalt.err (!%p1180_p11)
}
  0x41   : > { %1062 = dma.hbm_to_vmem [thread:$0]  (!%p1368_p12), %s1767_s4, 4608, %s1372_s18, [#allocation6], %s1258_s14, %s1258_s14, %s1259_s17  }
  0x42   : > { %p1779_p13 = scmp.ne.s32.totalorder %s1777_s13, 0 }
  0x43   : > { %p1780_p5 = scmp.eq.s32.totalorder (!%p1779_p13), %s1332_s28, 0 }
  0x44   : > { %266 = sbr.rel (%p1779_p13) target bundleno = 915 (0x393), region = 48 }
  0x4b   : > { %1229 = dma.done.wait (%p1780_p5), [#allocation3], 4608   ;;  %p1781_p0 = pmov %p1780_p5 }
  0x4d   : > { %1231 = vsyncadd (%p1781_p0), [#allocation3], 4294962688  ;;  %p1782_p6 = pmov %p1781_p0 }
  0x4e   : > { %p1783_p9 = pmov %p1781_p0 }
  0x4f   : > { %1233 = dma.done.wait (%p1782_p6), [#allocation6], 4608  }
  0x50   : > { %1235 = vsyncadd (%p1783_p9), [#allocation6], 4294962688  ;;  %p302_p10 = scmp.lt.s32.totalorder %s1332_s28, 1  ;;  %v1260_v0 = vmov 0.0   ;;  %v1261_v1 = vmov 0   ;;  %v307_v4 = vld [vmem:[%s1764_s1] sm:$0xff]  ;;  %v421_v32 = vlaneseq }
  0x51   : > { %396 = vmatprep.mubr.f32.mxu0 %v1260_v0  ;;  %1118 = vset.pattern.permute.xlu0 %v1261_v1  ;;  %vm325_vm0 = vcmask 64512   ;;  %v309_v5 = vld [vmem:[%s1765_s2] sm:$0xff]  ;;  %v310_v6 = vld [vmem:[%s1765_s2 + $0x8] sm:$0xff]  ;;  %s1262_s10 = smov 16   ;;  %s1263_s19 = smov 17   ;;  %v572_v48 = vld [vmem:[#allocation2 + $0x90] sm:$0xff] }
  0x52   : > { %s303_s13 = scalar_select %p302_p10, %s1332_s28, 1  ;;  %912 = vmatprep.mubr.f32.mxu1 %v1260_v0  ;;  %1119 = vset.pattern.permute.xlu1 %v1261_v1  ;;  %v308_v7 = vld [vmem:[%s1764_s1 + $0x8] sm:$0xff]  ;;  %v1520_v35 = vand.u32 127, %v421_v32  ;;  %v570_v38 = vld [vmem:[#allocation2 + $0x80] sm:$0xff]  ;;  %v573_v63 = vld [vmem:[#allocation2 + $0x98] sm:$0xff]  ;;  %vm844_vm9 = vcmask 130048  }
  0x53   : > { %317 = vperm.xlu0 %1118, %v309_v5   ;;  %s1266_s18 = smov 127   ;;  %s1267_s14 = smov 113   ;;  %v571_v41 = vld [vmem:[#allocation2 + $0x88] sm:$0xff]  ;;  %v583_v42 = vld [vmem:[#allocation5 + $0x80] sm:$0xff]  ;;  %v585_v1 = vld [vmem:[#allocation5 + $0x90] sm:$0xff] }
  0x54   : > { %s1040_s16 = sshll.u32 %s303_s13, 4  ;;  %s1264_s13 = smov 15   ;;  %vm423_vm1 = vcmp.lt.s32.totalorder %v1520_v35, 17  ;;  %v584_v43 = vld [vmem:[#allocation5 + $0x88] sm:$0xff]  ;;  %v428_v44 = vld [vmem:[#allocation2] sm:$0xff]  ;;  %vm460_vm2 = vcmp.lt.s32.totalorder %v1520_v35, 16 }
  0x55   : > { %s306_s17 = scalar_lea.vmem %s1763_s0, %s1040_s16  ;;  %s1265_s16 = smov 1   ;;  %v429_v45 = vld [vmem:[#allocation2 + $0x8] sm:$0xff]  ;;  %v440_v49 = vld [vmem:[#allocation5] sm:$0xff]  ;;  %vm499_vm3 = vcmp.lt.s32.totalorder %v1520_v35, 15  ;;  %vm538_vm4 = vcmp.lt.s32.totalorder %v1520_v35, 1  ;;  %vm603_vm5 = vcmp.lt.s32.totalorder %v1520_v35, 127 }
  0x56   : > { %v1436_v2 = vld [vmem:[%s306_s17 + $0x8] sm:$0xff]  ;;  %v1438_v3 = vld [vmem:[%s306_s17] sm:$0xff]  ;;  %s1268_s17 = smov 112   ;;  %s1269_s20 = smov 111   ;;  %vm642_vm6 = vcmp.lt.s32.totalorder %v1520_v35, 113  ;;  %vm681_vm7 = vcmp.lt.s32.totalorder %v1520_v35, 112 }
  0x57   : > { %332 = vmatprep.subr.mxu0 %v1436_v2  ;;  %322 = vperm.xlu0 %1118, %v310_v6   ;;  %v441_v50 = vld [vmem:[#allocation5 + $0x8] sm:$0xff]  ;;  %v466_v51 = vld [vmem:[#allocation2 + $0x20] sm:$0xff]  ;;  %vm720_vm8 = vcmp.lt.s32.totalorder %v1520_v35, 111  ;;  %s299_s8 = sand.u32 1, %s1246_s25   ;;  %s1041_s15 = sshll.u32 %s1332_s28, 8 }
  0x58   : > { %333 = vmatpush1.msra.mxu0 %v1438_v3  ;;  %v467_v52 = vld [vmem:[#allocation2 + $0x28] sm:$0xff]  ;;  %v479_v53 = vld [vmem:[#allocation5 + $0x20] sm:$0xff]  ;;  %s1029_s9 = sshll.u32 %s299_s8, 4  ;;  %s926_s28 = scalar_lea.sflag [#allocation4], %s299_s8 }
  0x59   : > { %1032 = vmatmul.mubr.msk.f32.vlgmr.msra.gmra.mrb[0].mxu0 %vm325_vm0, %v307_v4  ;;  %v480_v54 = vld [vmem:[#allocation5 + $0x28] sm:$0xff]  ;;  %v586_v4 = vld [vmem:[#allocation5 + $0x98] sm:$0xff]  ;;  %p1784_p1 = scmp.ne.s32.totalorder %s1775_s11, 0 }
  0x5a   : > { %402 = vmatprep.mubr.f32.mxu0 %v1260_v0 }
  0x5d   : > { %1033 = vmatmul.mubr.msk.f32.gmra.mrb[2].mxu0 %vm325_vm0, %v308_v7 }
  0xd2   : > { %v318_v8 = vpop.permute.xlu0 %317 }
  0xd6   : > { %v323_v13 = vpop.permute.xlu0 %322 }
 0x12c   : > { %v398_v9 = vpop.f32.mrb[0].mxu0 }
 0x12d   : > { %v399_v10 = vadd.f32 %v398_v9, %v318_v8  ;;  %v400_v11 = vpop.f32.mrb[1].mxu0 }
 0x12e   : > { %v401_v18 = vadd.f32 %v400_v11, %v318_v8 }
 0x12f   : > { %v1454_v12 = vmax.f32 %v399_v10, 0.0 }
 0x130   : > { %v404_v14 = vpop.f32.mrb[2].mxu0  ;;  %v410_v19 = vmax.f32 %v401_v18, 0.0  ;;  %v430_v18 = vld [vmem:[#allocation2 + $0x10] sm:$0xff] }
 0x131   : > { %v405_v15 = vadd.f32 %v404_v14, %v323_v13  ;;  %v406_v16 = vpop.f32.mrb[3].mxu0  ;;  %452 = vrot.lane.b32.xlu0 %v1454_v12, %s1262_s10  ;;  %413 = vrot.lane.b32.xlu1 %v1454_v12, %s1263_s19  ;;  %v1539_v57 = vmul.f32 %v570_v38, %v1454_v12  ;;  %v1542_v58 = vmul.f32 %v583_v42, %v1454_v12  ;;  %v506_v14 = vld [vmem:[#allocation2 + $0x48] sm:$0xff]  ;;  %v431_v42 = vld [vmem:[#allocation2 + $0x18] sm:$0xff] }
 0x132   : > { %v407_v20 = vadd.f32 %v406_v16, %v323_v13  ;;  %v1534_v55 = vmul.f32 %v571_v41, %v410_v19  ;;  %v1536_v56 = vmul.f32 %v584_v43, %v410_v19  ;;  %v505_v13 = vld [vmem:[#allocation2 + $0x40] sm:$0xff]  ;;  %v519_v16 = vld [vmem:[#allocation5 + $0x48] sm:$0xff]  ;;  %v442_v43 = vld [vmem:[#allocation5 + $0x10] sm:$0xff] }
 0x133   : > { %v1460_v17 = vmax.f32 %v405_v15, 0.0  ;;  %v518_v15 = vld [vmem:[#allocation5 + $0x40] sm:$0xff] }
 0x134   : > { %v1484_v21 = vmax.f32 %v407_v20, 0.0 }
 0x135   : > { %491 = vrot.lane.b32.xlu0 %v1454_v12, %s1264_s13  ;;  %415 = vrot.lane.b32.xlu1 %v1460_v17, %s1263_s19  ;;  %v1548_v0 = vmul.f32 %v572_v48, %v1460_v17  ;;  %v1559_v20 = vmul.f32 %v585_v1, %v1460_v17  ;;  %v468_v1 = vld [vmem:[#allocation2 + $0x30] sm:$0xff] }
 0x139   : > { %530 = vrot.lane.b32.xlu0 %v1454_v12, %s1265_s16  ;;  %454 = vrot.lane.b32.xlu1 %v1460_v17, %s1262_s10 }
 0x13d   : > { %595 = vrot.lane.b32.xlu0 %v1454_v12, %s1266_s18  ;;  %493 = vrot.lane.b32.xlu1 %v1460_v17, %s1264_s13 }
 0x141   : > { %634 = vrot.lane.b32.xlu0 %v1454_v12, %s1267_s14  ;;  %532 = vrot.lane.b32.xlu1 %v1460_v17, %s1265_s16 }
 0x145   : > { %673 = vrot.lane.b32.xlu0 %v1454_v12, %s1268_s17  ;;  %597 = vrot.lane.b32.xlu1 %v1460_v17, %s1266_s18 }
 0x149   : > { %712 = vrot.lane.b32.xlu0 %v1454_v12, %s1269_s20  ;;  %636 = vrot.lane.b32.xlu1 %v1460_v17, %s1267_s14 }
 0x14d   : > { %417 = vrot.lane.b32.xlu0 %v410_v19, %s1263_s19  ;;  %675 = vrot.lane.b32.xlu1 %v1460_v17, %s1268_s17 }
 0x151   : > { %456 = vrot.lane.b32.xlu0 %v410_v19, %s1262_s10  ;;  %714 = vrot.lane.b32.xlu1 %v1460_v17, %s1269_s20 }
 0x155   : > { %495 = vrot.lane.b32.xlu0 %v410_v19, %s1264_s13  ;;  %419 = vrot.lane.b32.xlu1 %v1484_v21, %s1263_s19 }
 0x159   : > { %534 = vrot.lane.b32.xlu0 %v410_v19, %s1265_s16  ;;  %458 = vrot.lane.b32.xlu1 %v1484_v21, %s1262_s10  ;;  %s301_s10 = scalar_lea.vmem [#allocation7], %s1029_s9 }
 0x15a   : > { %s940_s19 = sshll.u32 %s301_s10, 4  ;;  %s1723_s19 = int_to_ptr.vmem [resolvable:$true] %s940_s19 }
 0x15d   : > { %599 = vrot.lane.b32.xlu0 %v410_v19, %s1266_s18  ;;  %497 = vrot.lane.b32.xlu1 %v1484_v21, %s1264_s13 }
 0x161   : > { %638 = vrot.lane.b32.xlu0 %v410_v19, %s1267_s14  ;;  %536 = vrot.lane.b32.xlu1 %v1484_v21, %s1265_s16 }
 0x165   : > { %677 = vrot.lane.b32.xlu0 %v410_v19, %s1268_s17  ;;  %601 = vrot.lane.b32.xlu1 %v1484_v21, %s1266_s18  ;;  %s1721_s18 = scalar_lea.hbm %s1770_s7, %s1041_s15 }
 0x169   : > { %716 = vrot.lane.b32.xlu0 %v410_v19, %s1269_s20  ;;  %640 = vrot.lane.b32.xlu1 %v1484_v21, %s1267_s14  ;;  %v1556_v19 = vmul.f32 %v573_v63, %v1484_v21  ;;  %v557_v63 = vld [vmem:[#allocation5 + $0x60] sm:$0xff]  ;;  %s1184_s14 = scalar_lea.vmem %s1723_s19, 256 }
 0x16a   : > { %p1185_p12 = scmp.ne.s32.totalorder %s1723_s19, %s1184_s14 }
 0x16c   : > { %p1186_p2 = pnand %p1185_p12, %p1784_p1 }
 0x16d   : > { %679 = vrot.lane.b32.xlu1 %v1484_v21, %s1268_s17  ;;  %s1270_s17 = smov [#allocation7]  }
 0x16e   : > { %p1187_p3 = pneg %p1186_p2 }
 0x171   : > { %718 = vrot.lane.b32.xlu1 %v1484_v21, %s1269_s20  ;;  %s1188_s20 = sshll.u32 %s1270_s17, 4  ;;  %s1189_s20 = int_to_ptr.vmem [resolvable:$false] %s1188_s20 }
 0x172   : > { %s1190_s21 = scalar_lea.vmem %s1189_s20, 512  ;;  %p1191_p4 = scmp.lt.s32.totalorder %s1723_s19, %s1189_s20 }
 0x173   : > { %p1192_p7 = scmp.lt.s32.totalorder %s1190_s21, %s1184_s14 }
 0x175   : > { %p1193_p8 = por %p1192_p7, %p1191_p4 }
 0x177   : > { %p1194_p11 = pnand %p1193_p8, %p1187_p3 }
 0x1a3   : > { %v453_v22 = vpop.permute.xlu0 %452  ;;  %v414_v23 = vpop.permute.xlu1 %413 }
 0x1a7   : > { %v1500_v24 = vpop.permute.xlu0 %491  ;;  %v1502_v25 = vpop.permute.xlu1 %415 }
 0x1ab   : > { %v1504_v26 = vpop.permute.xlu0 %530  ;;  %v1506_v27 = vpop.permute.xlu1 %454 }
 0x1af   : > { %v1508_v28 = vpop.permute.xlu0 %595  ;;  %v1510_v29 = vpop.permute.xlu1 %493 }
 0x1b3   : > { %v1512_v30 = vpop.permute.xlu0 %634  ;;  %v1514_v31 = vpop.permute.xlu1 %532 }
 0x1b7   : > { %v1516_v33 = vpop.permute.xlu0 %673  ;;  %v1518_v34 = vpop.permute.xlu1 %597 }
 0x1bb   : > { %v1522_v36 = vpop.permute.xlu0 %712  ;;  %v1524_v37 = vpop.permute.xlu1 %636 }
 0x1bf   : > { %v418_v39 = vpop.permute.xlu0 %417  ;;  %v1527_v40 = vpop.permute.xlu1 %675 }
 0x1c0   : > { %v424_v46 = vsel %vm423_vm1, %v414_v23, %v418_v39  ;;  %v426_v47 = vsel %vm423_vm1, %v418_v39, %v414_v23  ;;  %v1562_v23 = vmul.f32 %v586_v4, %v1484_v21 }
 0x1c1   : > { %v432_v59 = vmul.f32 %v428_v44, %v426_v47  ;;  %v433_v60 = vmul.f32 %v429_v45, %v424_v46  ;;  %v444_v5 = vmul.f32 %v440_v49, %v426_v47  ;;  %v445_v6 = vmul.f32 %v441_v50, %v424_v46  ;;  %v443_v44 = vld [vmem:[#allocation5 + $0x18] sm:$0xff] }
 0x1c3   : > { %v457_v61 = vpop.permute.xlu0 %456  ;;  %v1544_v62 = vpop.permute.xlu1 %714 }
 0x1c4   : > { %v461_v7 = vsel %vm460_vm2, %v453_v22, %v457_v61  ;;  %v463_v8 = vsel %vm460_vm2, %v457_v61, %v453_v22 }
 0x1c5   : > { %v470_v9 = vmul.f32 %v466_v51, %v463_v8  ;;  %v471_v10 = vmul.f32 %v467_v52, %v461_v7  ;;  %v483_v11 = vmul.f32 %v479_v53, %v463_v8  ;;  %v484_v12 = vmul.f32 %v480_v54, %v461_v7  ;;  %v544_v52 = vld [vmem:[#allocation2 + $0x60] sm:$0xff]  ;;  %v545_v53 = vld [vmem:[#allocation2 + $0x68] sm:$0xff] }
 0x1c7   : > { %v474_v22 = vadd.f32 %v470_v9, %v432_v59  ;;  %v475_v32 = vadd.f32 %v471_v10, %v433_v60  ;;  %v487_v38 = vadd.f32 %v483_v11, %v444_v5  ;;  %v488_v39 = vadd.f32 %v484_v12, %v445_v6  ;;  %v496_v41 = vpop.permute.xlu0 %495  ;;  %v420_v45 = vpop.permute.xlu1 %419  ;;  %v469_v9 = vld [vmem:[#allocation2 + $0x38] sm:$0xff] }
 0x1c8   : > { %v500_v46 = vsel %vm499_vm3, %v1500_v24, %v496_v41  ;;  %v502_v17 = vsel %vm499_vm3, %v496_v41, %v1500_v24  ;;  %v425_v21 = vsel %vm423_vm1, %v1502_v25, %v420_v45  ;;  %v427_v47 = vsel %vm423_vm1, %v420_v45, %v1502_v25  ;;  %v558_v24 = vld [vmem:[#allocation5 + $0x68] sm:$0xff]  ;;  %v481_v25 = vld [vmem:[#allocation5 + $0x30] sm:$0xff]  ;;  %v482_v10 = vld [vmem:[#allocation5 + $0x38] sm:$0xff] }
 0x1c9   : > { %v509_v48 = vmul.f32 %v505_v13, %v502_v17  ;;  %v510_v49 = vmul.f32 %v506_v14, %v500_v46  ;;  %v522_v50 = vmul.f32 %v518_v15, %v502_v17  ;;  %v523_v51 = vmul.f32 %v519_v16, %v500_v46  ;;  %v609_v46 = vld [vmem:[#allocation2 + $0xa0] sm:$0xff] }
 0x1ca   : > { %v434_v54 = vmul.f32 %v430_v18, %v427_v47  ;;  %v435_v59 = vmul.f32 %v431_v42, %v425_v21  ;;  %v446_v60 = vmul.f32 %v442_v43, %v427_v47  ;;  %v447_v61 = vmul.f32 %v443_v44, %v425_v21 }
 0x1cb   : > { %v513_v4 = vadd.f32 %v509_v48, %v474_v22  ;;  %v514_v5 = vadd.f32 %v510_v49, %v475_v32  ;;  %v526_v6 = vadd.f32 %v522_v50, %v487_v38  ;;  %v527_v7 = vadd.f32 %v523_v51, %v488_v39  ;;  %v535_v8 = vpop.permute.xlu0 %534  ;;  %v459_v11 = vpop.permute.xlu1 %458  ;;  %v610_v50 = vld [vmem:[#allocation2 + $0xa8] sm:$0xff]  ;;  %v507_v51 = vld [vmem:[#allocation2 + $0x50] sm:$0xff] }
 0x1cc   : > { %v539_v12 = vsel %vm538_vm4, %v1504_v26, %v535_v8  ;;  %v541_v13 = vsel %vm538_vm4, %v535_v8, %v1504_v26  ;;  %v462_v14 = vsel %vm460_vm2, %v1506_v27, %v459_v11  ;;  %v464_v15 = vsel %vm460_vm2, %v459_v11, %v1506_v27  ;;  %v622_v27 = vld [vmem:[#allocation5 + $0xa0] sm:$0xff] }
 0x1cd   : > { %v548_v16 = vmul.f32 %v544_v52, %v541_v13  ;;  %v549_v18 = vmul.f32 %v545_v53, %v539_v12  ;;  %v561_v22 = vmul.f32 %v557_v63, %v541_v13  ;;  %v562_v32 = vmul.f32 %v558_v24, %v539_v12  ;;  %v649_v13 = vld [vmem:[#allocation2 + $0xc8] sm:$0xff] }
 0x1ce   : > { %v472_v38 = vmul.f32 %v468_v1, %v464_v15  ;;  %v473_v39 = vmul.f32 %v469_v9, %v462_v14  ;;  %v485_v41 = vmul.f32 %v481_v25, %v464_v15  ;;  %v486_v42 = vmul.f32 %v482_v10, %v462_v14  ;;  %v508_v1 = vld [vmem:[#allocation2 + $0x58] sm:$0xff] }
 0x1cf   : > { %v552_v43 = vadd.f32 %v548_v16, %v513_v4  ;;  %v553_v44 = vadd.f32 %v549_v18, %v514_v5  ;;  %v565_v45 = vadd.f32 %v561_v22, %v526_v6  ;;  %v566_v26 = vadd.f32 %v562_v32, %v527_v7  ;;  %v600_v17 = vpop.permute.xlu0 %599  ;;  %v498_v21 = vpop.permute.xlu1 %497  ;;  %v520_v4 = vld [vmem:[#allocation5 + $0x50] sm:$0xff]  ;;  %v521_v5 = vld [vmem:[#allocation5 + $0x58] sm:$0xff]  ;;  %v661_v22 = vld [vmem:[#allocation5 + $0xc0] sm:$0xff] }
 0x1d0   : > { %v476_v47 = vadd.f32 %v472_v38, %v434_v54  ;;  %v477_v48 = vadd.f32 %v473_v39, %v435_v59  ;;  %v489_v49 = vadd.f32 %v485_v41, %v446_v60  ;;  %v490_v52 = vadd.f32 %v486_v42, %v447_v61  ;;  %v623_v54 = vld [vmem:[#allocation5 + $0xa8] sm:$0xff]  ;;  %v547_v42 = vld [vmem:[#allocation2 + $0x78] sm:$0xff] }
 0x1d1   : > { %v578_v53 = vadd.f32 %v1539_v57, %v552_v43  ;;  %v579_v63 = vadd.f32 %v1534_v55, %v553_v44  ;;  %v591_v24 = vadd.f32 %v1542_v58, %v565_v45  ;;  %v604_v59 = vsel %vm603_vm5, %v1508_v28, %v600_v17  ;;  %v662_v32 = vld [vmem:[#allocation5 + $0xc8] sm:$0xff]  ;;  %v559_v43 = vld [vmem:[#allocation5 + $0x70] sm:$0xff]  ;;  %v560_v44 = vld [vmem:[#allocation5 + $0x78] sm:$0xff] }
 0x1d2   : > { %v606_v60 = vsel %vm603_vm5, %v600_v17, %v1508_v28  ;;  %v501_v55 = vsel %vm499_vm3, %v1510_v29, %v498_v21  ;;  %v503_v57 = vsel %vm499_vm3, %v498_v21, %v1510_v29  ;;  %v592_v58 = vadd.f32 %v1536_v56, %v566_v26  ;;  %v648_v28 = vld [vmem:[#allocation2 + $0xc0] sm:$0xff]  ;;  %v546_v29 = vld [vmem:[#allocation2 + $0x70] sm:$0xff] }
 0x1d3   : > { %v613_v61 = vmul.f32 %v609_v46, %v604_v59  ;;  %v614_v6 = vmul.f32 %v610_v50, %v606_v60  ;;  %v626_v7 = vmul.f32 %v622_v27, %v604_v59  ;;  %v639_v8 = vpop.permute.xlu0 %638  ;;  %v537_v9 = vpop.permute.xlu1 %536  ;;  %v511_v25 = vmul.f32 %v507_v51, %v503_v57  ;;  %v700_v59 = vld [vmem:[#allocation5 + $0xe0] sm:$0xff] }
 0x1d4   : > { %v512_v10 = vmul.f32 %v508_v1, %v501_v55  ;;  %v524_v11 = vmul.f32 %v520_v4, %v503_v57  ;;  %v525_v12 = vmul.f32 %v521_v5, %v501_v55  ;;  %v627_v16 = vmul.f32 %v623_v54, %v606_v60  ;;  %v687_v5 = vld [vmem:[#allocation2 + $0xe0] sm:$0xff]  ;;  %v688_v54 = vld [vmem:[#allocation2 + $0xe8] sm:$0xff] }
 0x1d5   : > { %v617_v14 = vadd.f32 %v613_v61, %v578_v53  ;;  %v618_v15 = vadd.f32 %v614_v6, %v579_v63  ;;  %v630_v18 = vadd.f32 %v626_v7, %v591_v24  ;;  %v515_v38 = vadd.f32 %v511_v25, %v476_v47  ;;  %v701_v61 = vld [vmem:[#allocation5 + $0xe8] sm:$0xff] }
 0x1d6   : > { %v516_v56 = vadd.f32 %v512_v10, %v477_v48  ;;  %v528_v39 = vadd.f32 %v524_v11, %v489_v49  ;;  %v529_v41 = vadd.f32 %v525_v12, %v490_v52  ;;  %v643_v45 = vsel %vm642_vm6, %v1512_v30, %v639_v8 }
 0x1d7   : > { %v645_v26 = vsel %vm642_vm6, %v639_v8, %v1512_v30  ;;  %v540_v46 = vsel %vm538_vm4, %v1514_v31, %v537_v9  ;;  %v542_v17 = vsel %vm538_vm4, %v537_v9, %v1514_v31  ;;  %v602_v21 = vpop.permute.xlu1 %601  ;;  %v652_v47 = vmul.f32 %v648_v28, %v643_v45  ;;  %v678_v27 = vpop.permute.xlu0 %677  ;;  %v611_v9 = vld [vmem:[#allocation2 + $0xb0] sm:$0xff]  ;;  %v612_v28 = vld [vmem:[#allocation2 + $0xb8] sm:$0xff] }
 0x1d8   : > { %v653_v48 = vmul.f32 %v649_v13, %v645_v26  ;;  %v665_v49 = vmul.f32 %v661_v22, %v643_v45  ;;  %v666_v50 = vmul.f32 %v662_v32, %v645_v26  ;;  %v550_v51 = vmul.f32 %v546_v29, %v542_v17  ;;  %v624_v13 = vld [vmem:[#allocation5 + $0xb0] sm:$0xff] }
 0x1d9   : > { %v551_v52 = vmul.f32 %v547_v42, %v540_v46  ;;  %v563_v53 = vmul.f32 %v559_v43, %v542_v17  ;;  %v564_v63 = vmul.f32 %v560_v44, %v540_v46  ;;  %v631_v24 = vadd.f32 %v627_v16, %v592_v58  ;;  %v739_v46 = vld [vmem:[#allocation5 + $0x100] sm:$0xff]  ;;  %v650_v17 = vld [vmem:[#allocation2 + $0xd0] sm:$0xff] }
 0x1da   : > { %v656_v30 = vadd.f32 %v652_v47, %v617_v14  ;;  %v657_v1 = vadd.f32 %v653_v48, %v618_v15  ;;  %v669_v4 = vadd.f32 %v665_v49, %v630_v18  ;;  %v554_v60 = vadd.f32 %v550_v51, %v515_v38  ;;  %v625_v14 = vld [vmem:[#allocation5 + $0xb8] sm:$0xff] }
 0x1db   : > { %v555_v55 = vadd.f32 %v551_v52, %v516_v56  ;;  %v567_v31 = vadd.f32 %v563_v53, %v528_v39  ;;  %v568_v57 = vadd.f32 %v564_v63, %v529_v41  ;;  %v641_v6 = vpop.permute.xlu1 %640  ;;  %v670_v7 = vadd.f32 %v666_v50, %v631_v24  ;;  %v717_v32 = vpop.permute.xlu0 %716  ;;  %v726_v41 = vld [vmem:[#allocation2 + $0x100] sm:$0xff]  ;;  %v740_v52 = vld [vmem:[#allocation5 + $0x108] sm:$0xff] }
 0x1dc   : > { %v682_v8 = vsel %vm681_vm7, %v1516_v33, %v678_v27  ;;  %v684_v58 = vsel %vm681_vm7, %v678_v27, %v1516_v33  ;;  %v605_v25 = vsel %vm603_vm5, %v1518_v34, %v602_v21  ;;  %v607_v15 = vsel %vm603_vm5, %v602_v21, %v1518_v34  ;;  %v727_v34 = vld [vmem:[#allocation2 + $0x108] sm:$0xff]  ;;  %v663_v21 = vld [vmem:[#allocation5 + $0xd0] sm:$0xff] }
 0x1dd   : > { %v691_v10 = vmul.f32 %v687_v5, %v682_v8  ;;  %v692_v11 = vmul.f32 %v688_v54, %v684_v58  ;;  %v704_v12 = vmul.f32 %v700_v59, %v682_v8  ;;  %v705_v16 = vmul.f32 %v701_v61, %v684_v58  ;;  %v689_v54 = vld [vmem:[#allocation2 + $0xf0] sm:$0xff]  ;;  %v690_v59 = vld [vmem:[#allocation2 + $0xf8] sm:$0xff] }
 0x1de   : > { %v580_v18 = vadd.f32 %v1548_v0, %v554_v60  ;;  %v581_v33 = vadd.f32 %v1556_v19, %v555_v55  ;;  %v593_v22 = vadd.f32 %v1559_v20, %v567_v31  ;;  %v594_v39 = vadd.f32 %v1562_v23, %v568_v57  ;;  %v651_v20 = vld [vmem:[#allocation2 + $0xd8] sm:$0xff]  ;;  %v702_v61 = vld [vmem:[#allocation5 + $0xf0] sm:$0xff] }
 0x1df   : > { %v695_v29 = vadd.f32 %v691_v10, %v656_v30  ;;  %v696_v38 = vadd.f32 %v692_v11, %v657_v1  ;;  %v708_v56 = vadd.f32 %v704_v12, %v669_v4  ;;  %v680_v42 = vpop.permute.xlu1 %679  ;;  %v615_v43 = vmul.f32 %v611_v9, %v605_v25  ;;  %v664_v23 = vld [vmem:[#allocation5 + $0xd8] sm:$0xff]  ;;  %v741_v11 = vld [vmem:[#allocation5 + $0x110] sm:$0xff] }
 0x1e0   : > { %v616_v44 = vmul.f32 %v612_v28, %v607_v15  ;;  %v628_v45 = vmul.f32 %v624_v13, %v605_v25  ;;  %v629_v26 = vmul.f32 %v625_v14, %v607_v15  ;;  %v721_v0 = vsel %vm720_vm8, %v1522_v36, %v717_v32  ;;  %v729_v10 = vld [vmem:[#allocation2 + $0x118] sm:$0xff] }
 0x1e1   : > { %v723_v19 = vsel %vm720_vm8, %v717_v32, %v1522_v36  ;;  %v644_v47 = vsel %vm642_vm6, %v1524_v37, %v641_v6  ;;  %v646_v48 = vsel %vm642_vm6, %v641_v6, %v1524_v37  ;;  %v709_v49 = vadd.f32 %v705_v16, %v670_v7  ;;  %v703_v6 = vld [vmem:[#allocation5 + $0xf8] sm:$0xff]  ;;  %v728_v7 = vld [vmem:[#allocation2 + $0x110] sm:$0xff] }
 0x1e2   : > { %v619_v50 = vadd.f32 %v615_v43, %v580_v18  ;;  %v620_v27 = vadd.f32 %v616_v44, %v581_v33  ;;  %v632_v51 = vadd.f32 %v628_v45, %v593_v22  ;;  %v633_v53 = vadd.f32 %v629_v26, %v594_v39  ;;  %v742_v12 = vld [vmem:[#allocation5 + $0x118] sm:$0xff] }
 0x1e3   : > { %v730_v63 = vmul.f32 %v726_v41, %v721_v0  ;;  %v731_v24 = vmul.f32 %v727_v34, %v723_v19  ;;  %v743_v36 = vmul.f32 %v739_v46, %v721_v0  ;;  %v654_v30 = vmul.f32 %v650_v17, %v644_v47  ;;  %v719_v60 = vpop.permute.xlu1 %718 }
 0x1e4   : > { %v655_v1 = vmul.f32 %v651_v20, %v646_v48  ;;  %v667_v4 = vmul.f32 %v663_v21, %v644_v47  ;;  %v668_v5 = vmul.f32 %v664_v23, %v646_v48  ;;  %v744_v37 = vmul.f32 %v740_v52, %v723_v19 }
 0x1e5   : > { %v1648_v55 = vadd.f32 %v730_v63, %v695_v29  ;;  %v1650_v31 = vadd.f32 %v731_v24, %v696_v38  ;;  %v1652_v57 = vadd.f32 %v743_v36, %v708_v56  ;;  %v658_v8 = vadd.f32 %v654_v30, %v619_v50 }
 0x1e6   : > { %v659_v58 = vadd.f32 %v655_v1, %v620_v27  ;;  %v671_v9 = vadd.f32 %v667_v4, %v632_v51  ;;  %v672_v25 = vadd.f32 %v668_v5, %v633_v53  ;;  %v683_v28 = vsel %vm681_vm7, %v1527_v40, %v680_v42  ;;  %v312_v53 = vld [vmem:[%s1769_s6] sm:$0xff] }
 0x1e7   : > { %v685_v13 = vsel %vm681_vm7, %v680_v42, %v1527_v40  ;;  %v722_v14 = vsel %vm720_vm8, %v1544_v62, %v719_v60  ;;  %v724_v15 = vsel %vm720_vm8, %v719_v60, %v1544_v62  ;;  %v693_v16 = vmul.f32 %v689_v54, %v683_v28 }
 0x1e8   : > { %v694_v18 = vmul.f32 %v690_v59, %v685_v13  ;;  %v706_v33 = vmul.f32 %v702_v61, %v683_v28  ;;  %v707_v22 = vmul.f32 %v703_v6, %v685_v13  ;;  %v732_v32 = vmul.f32 %v728_v7, %v722_v14 }
 0x1e9   : > { %v733_v29 = vmul.f32 %v729_v10, %v724_v15  ;;  %v745_v38 = vmul.f32 %v741_v11, %v722_v14  ;;  %v746_v56 = vmul.f32 %v742_v12, %v724_v15  ;;  %v1666_v39 = vadd.f32 %v744_v37, %v709_v49 }
 0x1ea   : > { %v697_v41 = vadd.f32 %v693_v16, %v658_v8  ;;  %v698_v40 = vadd.f32 %v694_v18, %v659_v58  ;;  %v710_v42 = vadd.f32 %v706_v33, %v671_v9  ;;  %v711_v43 = vadd.f32 %v707_v22, %v672_v25 }
 0x1eb   : > { %v751_v44 = vadd.f32 %v1650_v31, %v1648_v55  ;;  %v763_v35 = vmul.f32 %v1648_v55, %v1648_v55  ;;  %v764_v62 = vmul.f32 %v1650_v31, %v1650_v31  ;;  %v757_v0 = vadd.f32 %v1666_v39, %v1652_v57 }
 0x1ec   : > { %v1674_v45 = vadd.f32 %v732_v32, %v697_v41  ;;  %v1676_v26 = vadd.f32 %v733_v29, %v698_v40  ;;  %v1678_v34 = vadd.f32 %v745_v38, %v710_v42  ;;  %v1680_v46 = vadd.f32 %v746_v56, %v711_v43 }
 0x1ed   : > { %752 = vadd.xlane.f32.xlu0 %v751_v44  ;;  %v771_v17 = vadd.f32 %v764_v62, %v763_v35  ;;  %v767_v21 = vmul.f32 %v1652_v57, %v1652_v57  ;;  %v768_v23 = vmul.f32 %v1666_v39, %v1666_v39 }
 0x1ee   : > { %v754_v19 = vadd.f32 %v1676_v26, %v1674_v45  ;;  %v760_v20 = vadd.f32 %v1680_v46, %v1678_v34  ;;  %v765_v47 = vmul.f32 %v1674_v45, %v1674_v45  ;;  %v766_v48 = vmul.f32 %v1676_v26, %v1676_v26 }
 0x1ef   : > { %772 = vadd.xlane.f32.xlu1 %v771_v17  ;;  %v777_v49 = vadd.f32 %v768_v23, %v767_v21  ;;  %v769_v27 = vmul.f32 %v1678_v34, %v1678_v34  ;;  %v770_v51 = vmul.f32 %v1680_v46, %v1680_v46 }
 0x1f0   : > { %v774_v50 = vadd.f32 %v766_v48, %v765_v47 }
 0x1f1   : > { %758 = vadd.xlane.f32.xlu0 %v757_v0  ;;  %v780_v52 = vadd.f32 %v770_v51, %v769_v27 }
 0x1f3   : > { %755 = vadd.xlane.f32.xlu1 %v754_v19 }
 0x1f5   : > { %761 = vadd.xlane.f32.xlu0 %v760_v20 }
 0x1f7   : > { %778 = vadd.xlane.f32.xlu1 %v777_v49 }
 0x1f9   : > { %775 = vadd.xlane.f32.xlu0 %v774_v50 }
 0x1fd   : > { %781 = vadd.xlane.f32.xlu0 %v780_v52 }
 0x208   : > { %841 = vperm.xlu1 %1119, %v312_v53  }
 0x27a   : > { %v753_v63 = vpop.xlane.xlu0 %752 }
 0x27b   : > { %v783_v24 = vmul.f32 0.00390625, %v753_v63 }
 0x27c   : > { %v773_v36 = vpop.xlane.xlu1 %772 }
 0x27d   : > { %v787_v30 = vmul.f32 0.00390625, %v773_v36  ;;  %v791_v1 = vmul.f32 %v783_v24, %v783_v24  ;;  %v803_v44 = vsub.f32 %v1648_v55, %v783_v24  ;;  %v804_v35 = vsub.f32 %v1650_v31, %v783_v24 }
 0x27e   : > { %v759_v4 = vpop.xlane.xlu0 %758 }
 0x27f   : > { %v785_v54 = vmul.f32 0.00390625, %v759_v4  ;;  %v795_v59 = vsub.f32 %v787_v30, %v791_v1  ;;  %v311_v1 = vld [vmem:[%s1768_s5] sm:$0xff] }
 0x280   : > { %v756_v5 = vpop.xlane.xlu1 %755 }
 0x281   : > { %v784_v37 = vmul.f32 0.00390625, %v756_v5  ;;  %v793_v7 = vmul.f32 %v785_v54, %v785_v54  ;;  %v799_v8 = vmax.f32 %v795_v59, 0.0  ;;  %v807_v40 = vsub.f32 %v1652_v57, %v785_v54 }
 0x282   : > { %v762_v60 = vpop.xlane.xlu0 %761  ;;  %v808_v42 = vsub.f32 %v1666_v39, %v785_v54 }
 0x283   : > { %v786_v9 = vmul.f32 0.00390625, %v762_v60  ;;  %v792_v10 = vmul.f32 %v784_v37, %v784_v37  ;;  %v811_v13 = vadd.f32 1e-05, %v799_v8  ;;  %v805_v62 = vsub.f32 %v1674_v45, %v784_v37 }
 0x284   : > { %v779_v61 = vpop.xlane.xlu1 %778  ;;  %v806_v17 = vsub.f32 %v1676_v26, %v784_v37 }
 0x285   : > { %v789_v6 = vmul.f32 0.00390625, %v779_v61  ;;  %v794_v18 = vmul.f32 %v786_v9, %v786_v9  ;;  %v809_v23 = vsub.f32 %v1678_v34, %v786_v9  ;;  %v810_v47 = vsub.f32 %v1680_v46, %v786_v9 }
 0x286   : > { %v776_v58 = vpop.xlane.xlu0 %775 }
 0x287   : > { %v797_v25 = vsub.f32 %v789_v6, %v793_v7  ;;  %v788_v11 = vmul.f32 0.00390625, %v776_v58 }
 0x288   : > { %v842_v4 = vpop.permute.xlu1 %841 }
 0x289   : > { %v801_v12 = vmax.f32 %v797_v25, 0.0  ;;  %v796_v28 = vsub.f32 %v788_v11, %v792_v10 }
 0x28a   : > { %v782_v14 = vpop.xlane.xlu0 %781 }
 0x28b   : > { %v813_v15 = vadd.f32 1e-05, %v801_v12  ;;  %v800_v16 = vmax.f32 %v796_v28, 0.0  ;;  %v790_v33 = vmul.f32 0.00390625, %v782_v14 }
 0x28d   : > { %1120 = vrsqrt.f32 %v813_v15  ;;  %v812_v22 = vadd.f32 1e-05, %v800_v16  ;;  %v798_v32 = vsub.f32 %v790_v33, %v794_v18 }
 0x28e   : > { %1122 = vrsqrt.f32 %v811_v13 }
 0x28f   : > { %1124 = vrsqrt.f32 %v812_v22  ;;  %v802_v29 = vmax.f32 %v798_v32, 0.0 }
 0x291   : > { %v814_v38 = vadd.f32 1e-05, %v802_v29 }
 0x293   : > { %1126 = vrsqrt.f32 %v814_v38 }
 0x297   : > { %v1121_v56 = vpop.eup %1120 }
 0x298   : > { %v1123_v41 = vpop.eup %1122  ;;  %v824_v0 = vmul.f32 %v1121_v56, %v808_v42  ;;  %v823_v19 = vmul.f32 %v1121_v56, %v807_v40 }
 0x299   : > { %v1125_v43 = vpop.eup %1124  ;;  %v820_v20 = vmul.f32 %v1123_v41, %v804_v35  ;;  %v819_v21 = vmul.f32 %v1123_v41, %v803_v44 }
 0x29a   : > { %v822_v57 = vmul.f32 %v1125_v43, %v806_v17  ;;  %v821_v48 = vmul.f32 %v1125_v43, %v805_v62  ;;  %v832_v50 = vmax.f32 %v824_v0, 0.0  ;;  %v831_v27 = vmax.f32 %v823_v19, 0.0 }
 0x29b   : > { %v828_v31 = vmax.f32 %v820_v20, 0.0  ;;  %v827_v51 = vmax.f32 %v819_v21, 0.0 }
 0x29c   : > { %v830_v45 = vmax.f32 %v822_v57, 0.0  ;;  %v829_v52 = vmax.f32 %v821_v48, 0.0 }
 0x29d   : > { %v1127_v39 = vpop.eup %1126  ;;  %v836_v63 = vmul.f32 %v832_v50, %v828_v31  ;;  %v835_v36 = vmul.f32 %v831_v27, %v827_v51 }
 0x29e   : > { %v826_v49 = vmul.f32 %v1127_v39, %v810_v47  ;;  %v825_v55 = vmul.f32 %v1127_v39, %v809_v23 }
 0x2a0   : > { %v834_v26 = vmax.f32 %v826_v49, 0.0  ;;  %v833_v53 = vmax.f32 %v825_v55, 0.0 }
 0x2a2   : > { %v838_v24 = vmul.f32 %v834_v26, %v830_v45  ;;  %v837_v34 = vmul.f32 %v833_v53, %v829_v52 }
 0x2a4   : > { %v1042_v46 = vpack.c.bf16 %v838_v24, %v836_v63  ;;  %v1044_v30 = vpack.c.bf16 %v837_v34, %v835_v36 }
 0x2a6   : > { %1043 = vmatprep.subr.bf16.mxu1 %v1042_v46 }
 0x2a7   : > { %1045 = vmatpush1.bf16.msra.mxu1 %v1044_v30 }
 0x2aa   : > { %1034 = vmatmul.mubr.msk.f32.vlgmr.msra.gmra.mrb[0].mxu1 %vm844_vm9, %v311_v1 }
 0x37d   : > { %v914_v5 = vpop.f32.mrb[0].mxu1 }
 0x37e   : > { %v915_v54 = vadd.f32 %v914_v5, %v842_v4  ;;  %v916_v59 = vpop.f32.mrb[1].mxu1 }
 0x37f   : > { %v917_v60 = vadd.f32 %v916_v59, %v842_v4 }
 0x380   : > { %v919_v37 = vmax.f32 %v915_v54, 0.0 }
 0x381   : > { %v920_v61 = vmax.f32 %v917_v60, 0.0 }
 0x382   : > { %v921_v6 = vadd.f32 %v919_v37, %v1438_v3 }
 0x383   : > { %v922_v7 = vadd.f32 %v920_v61, %v1436_v2 }
 0x384   : > { %923 = vst [vmem:[%s301_s10] sm:$0xff] %v921_v6 }
 0x385   : > { %924 = vst [vmem:[%s301_s10 + $0x8] sm:$0xff] %v922_v7 }
 0x386   : > { %1197 = shalt.err (!%p1194_p11)
}
 0x387   : > { %s1198_s22 = scalar_lea.hbm %s1721_s18, 256  ;;  %s1202_s8 = scalar_lea.hbm %s1770_s7, 512 }
 0x388   : > { %p1199_p13 = scmp.ne.s32.totalorder %s1721_s18, %s1198_s22  ;;  %p1203_p6 = scmp.lt.u32.totalorder %s1721_s18, %s1770_s7 }
 0x389   : > { %p1204_p9 = scmp.lt.u32.totalorder %s1202_s8, %s1198_s22  ;;  %p1206_p12 = scmp.lt.u32.totalorder %s1198_s22, %s1721_s18 }
 0x38a   : > { %p1200_p5 = pnand %p1199_p13, %p1784_p1 }
 0x38b   : > { %p1205_p10 = por %p1204_p9, %p1203_p6 }
 0x38c   : > { %p1201_p0 = pneg %p1200_p5 }
 0x38d   : > { %p1207_p2 = por %p1206_p12, %p1205_p10 }
 0x38f   : > { %p1208_p3 = pnand %p1207_p2, %p1201_p0 }
 0x391   : > { %1211 = shalt.err (!%p1208_p3)
}
 0x392   : > { %1054 = dma.vmem_to_hbm [thread:$0]  (%p1784_p1), %s1723_s19, 256, %s1721_s18, %s926_s28  }
 0x393 PF: > { %p1071_p4 = scmp.ge.s32.totalorder %s1254_s27, 2  ;;  %s952_s10 = sand.u32 1, %s1242_s24  }
 0x394   : > { %p1785_p7 = scmp.ne.s32.totalorder %s1776_s12, 0  ;;  %s953_s13 = scalar_lea.sflag [#allocation4], %s952_s10 }
 0x396   : > { %p1064_p8 = pnand %p1071_p4, %p1785_p7 }
 0x398   : > { %1237 = dma.done.wait (!%p1064_p8), %s953_s13, 256  }
 0x399   : > { %1239 = vsyncadd (!%p1064_p8), %s953_s13, 4294967040  ;;  %s1786_s16 = sld [smem:[#allocation11_spill]]  ;;  %p19_p11 = scmp.ge.s32.totalorder %s1336_s30, 4  }
 0x39a   : > { %s1787_s24 = smov %s1246_s25  ;;  %s1788_s25 = smov %s1250_s26 }
 0x39b   : > { %s1790_s27 = smov %s1336_s30  ;;  %21 = sbr.rel (!%p19_p11) target bundleno = 5 (0x5), region = 108 }
 0x39f   : > { %s1789_s26 = smov %s1786_s16 }
 0x3a2   :  { %958 = vsyncpa [#allocation3], 1 }
 0x3a3   :  { %960 = vsyncpa [#allocation3 + $0x1], 1 }
 0x3a4   :  { %961 = vsyncpa [#allocation6], 1 }
 0x3a5   :  { %962 = vsyncpa [#allocation4], 1 }
 0x3a6   :  { %964 = vsyncpa [#allocation4 + $0x1], 1 }

</bundles_post_ra>
